<compile_context>
chip_gen: v5e
topology: v5e:2x2
jax: 0.10.0
libtpu: 0.0.40
codegen_flags: <defaults>
</compile_context>

<pallas_src>
import functools
import math

import jax
import jax.numpy as jnp
from jax.experimental import pallas as pl
from jax.experimental.pallas import tpu as pltpu

LANE = 128                     # lane width; feature/hidden/class dims pad to this
DEF_TM = 128                   # node-row tile (multiple of 8)
DEF_TK = 256                   # source-node reduction tile for A @ x (multiple of 128)
STORE_DTYPE = jnp.bfloat16     # storage dtype for A / activations / weights


# ----------------------------------------------------------------------------- helpers
def _round_up(x, m):
    return (x + m - 1) // m * m


def _pad2(a, rows, cols):
    return jnp.pad(a, ((0, rows - a.shape[0]), (0, cols - a.shape[1])))


def _compiler_params(block_bytes, grid_rank=1):
    # Double-buffered pipeline => ~2x the per-step block footprint, plus headroom.
    # Clamp to 64 MiB so the config stays inside v7x's physical VMEM
    # (v5e/v6e have 128 MiB and simply use less).
    vmem = int(min(max(2 * block_bytes + (2 << 20), 32 << 20), 64 << 20))
    sem = ("parallel",) + ("arbitrary",) * (grid_rank - 1)
    return pltpu.CompilerParams(dimension_semantics=sem, vmem_limit_bytes=vmem)


# ----------------------------------------------------------------------------- kernels
def _row_matmul_kernel(x_ref, w_ref, o_ref):
    # u = x @ W1  (projection used by the re-associated layer-1 path)
    o_ref[...] = jnp.dot(x_ref[...], w_ref[...],
                         preferred_element_type=jnp.float32).astype(o_ref.dtype)


def _gin_layer_kernel(a_ref, xk_ref, xr_ref, w1_ref, b1_ref, w2_ref, b2_ref,
                      o_ref, acc_ref):
    """One GIN layer, K-tiled aggregation: relu(MLP((1+eps)*x + A@x)), eps=0."""
    k = pl.program_id(1)

    @pl.when(k == 0)
    def _():
        acc_ref[...] = xr_ref[...].astype(jnp.float32)          # self term, eps = 0

    # sum aggregation over incoming edges (f32 accumulate on the MXU)
    acc_ref[...] += jnp.dot(a_ref[...], xk_ref[...], preferred_element_type=jnp.float32)

    @pl.when(k == pl.num_programs(1) - 1)
    def _():
        cdt = a_ref.dtype
        h = jnp.dot(acc_ref[...].astype(cdt), w1_ref[...],
                    preferred_element_type=jnp.float32) + b1_ref[...]
        h = jnp.maximum(h, 0.0)
        h = jnp.dot(h.astype(cdt), w2_ref[...],
                    preferred_element_type=jnp.float32) + b2_ref[...]
        o_ref[...] = jnp.maximum(h, 0.0).astype(o_ref.dtype)    # F.relu after gconv


def _gin_layer_pre_kernel(a_ref, uk_ref, ur_ref, b1_ref, w2_ref, b2_ref,
                          o_ref, acc_ref):
    """Re-associated layer (u = x @ W1 precomputed): relu(relu(u + A@u + b1) @ W2 + b2)."""
    k = pl.program_id(1)

    @pl.when(k == 0)
    def _():
        acc_ref[...] = ur_ref[...].astype(jnp.float32)

    acc_ref[...] += jnp.dot(a_ref[...], uk_ref[...], preferred_element_type=jnp.float32)

    @pl.when(k == pl.num_programs(1) - 1)
    def _():
        cdt = a_ref.dtype
        h = jnp.maximum(acc_ref[...] + b1_ref[...], 0.0)
        h = jnp.dot(h.astype(cdt), w2_ref[...],
                    preferred_element_type=jnp.float32) + b2_ref[...]
        o_ref[...] = jnp.maximum(h, 0.0).astype(o_ref.dtype)


def _gin_layer2_cls_kernel(a_ref, xk_ref, xr_ref, w1_ref, b1_ref, w2_ref, b2_ref,
                           wl1_ref, wl2_ref, bl_ref, o_ref, acc_ref, *, nclass):
    """Layer-2 GIN conv fused with the res=True classifier + log_softmax."""
    k = pl.program_id(1)

    @pl.when(k == 0)
    def _():
        acc_ref[...] = xr_ref[...].astype(jnp.float32)          # self term (x1 row tile)

    acc_ref[...] += jnp.dot(a_ref[...], xk_ref[...], preferred_element_type=jnp.float32)

    @pl.when(k == pl.num_programs(1) - 1)
    def _():
        cdt = a_ref.dtype
        h = jnp.dot(acc_ref[...].astype(cdt), w1_ref[...],
                    preferred_element_type=jnp.float32) + b1_ref[...]
        h = jnp.maximum(h, 0.0)
        h = jnp.dot(h.astype(cdt), w2_ref[...],
                    preferred_element_type=jnp.float32) + b2_ref[...]
        x2 = jnp.maximum(h, 0.0)
        # logits = concat([x1, x2], -1) @ Wlin + blin, split per half
        logits = (jnp.dot(xr_ref[...], wl1_ref[...], preferred_element_type=jnp.float32)
                  + jnp.dot(x2.astype(cdt), wl2_ref[...], preferred_element_type=jnp.float32)
                  + bl_ref[...])
        # mask padded class lanes so they don't perturb the softmax
        col = jax.lax.broadcasted_iota(jnp.int32, logits.shape, 1)
        logits = jnp.where(col < nclass, logits, jnp.float32(-1e30))
        m = jnp.max(logits, axis=1, keepdims=True)
        z = logits - m
        lse = jnp.log(jnp.sum(jnp.exp(z), axis=1, keepdims=True))
        o_ref[...] = z - lse


# ----------------------------------------------------------------------------- pallas_call wrappers
def _row_matmul(x, w, *, tm):
    Np, Fin = x.shape
    Hp = w.shape[1]
    isz = x.dtype.itemsize
    blk = (tm * Fin + Fin * Hp + tm * Hp) * isz
    return pl.pallas_call(
        _row_matmul_kernel,
        grid=(Np // tm,),
        in_specs=[pl.BlockSpec((tm, Fin), lambda i: (i, 0)),
                  pl.BlockSpec((Fin, Hp), lambda i: (0, 0))],
        out_specs=pl.BlockSpec((tm, Hp), lambda i: (i, 0)),
        out_shape=jax.ShapeDtypeStruct((Np, Hp), x.dtype),
        compiler_params=_compiler_params(blk, grid_rank=1),
    )(x, w)


def _gin_layer1(A, x, w1, b1, w2, b2, *, tm, tk):
    """First GIN layer -> x1 [Np, Hp]."""
    Np = A.shape[0]
    Hp = w1.shape[1]
    isz = A.dtype.itemsize

    if x.shape[1] > Hp:
        # Re-associate: (x + A@x) @ W1 == (x@W1) + A @ (x@W1); project to the narrow
        # hidden width first so the dominant aggregation matmul has output width Hp.
        u = _row_matmul(x, w1, tm=tm)                           # [Np, Hp]
        kernel = _gin_layer_pre_kernel
        args = (A, u, u, b1, w2, b2)
        in_specs = [
            pl.BlockSpec((tm, tk), lambda i, k: (i, k)),        # adjacency block (streamed)
            pl.BlockSpec((tk, Hp), lambda i, k: (k, 0)),        # u source-node block
            pl.BlockSpec((tm, Hp), lambda i, k: (i, 0)),        # u row block (self term)
            pl.BlockSpec((1, Hp), lambda i, k: (0, 0)),         # b1
            pl.BlockSpec((Hp, Hp), lambda i, k: (0, 0)),        # W2
            pl.BlockSpec((1, Hp), lambda i, k: (0, 0)),         # b2
        ]
        acc_w = Hp
        blk = (tm * tk + tk * Hp + tm * Hp + Hp * Hp + tm * Hp) * isz \
            + 2 * Hp * 4 + tm * Hp * 4
    else:
        Fin = x.shape[1]
        kernel = _gin_layer_kernel
        args = (A, x, x, w1, b1, w2, b2)
        in_specs = [
            pl.BlockSpec((tm, tk), lambda i, k: (i, k)),        # adjacency block (streamed)
            pl.BlockSpec((tk, Fin), lambda i, k: (k, 0)),       # x source-node block
            pl.BlockSpec((tm, Fin), lambda i, k: (i, 0)),       # x row block (self term)
            pl.BlockSpec((Fin, Hp), lambda i, k: (0, 0)),       # W1
            pl.BlockSpec((1, Hp), lambda i, k: (0, 0)),         # b1
            pl.BlockSpec((Hp, Hp), lambda i, k: (0, 0)),        # W2
            pl.BlockSpec((1, Hp), lambda i, k: (0, 0)),         # b2
        ]
        acc_w = Fin
        blk = (tm * tk + tk * Fin + tm * Fin + Fin * Hp + Hp * Hp + tm * Hp) * isz \
            + 2 * Hp * 4 + tm * Fin * 4

    return pl.pallas_call(
        kernel,
        grid=(Np // tm, Np // tk),
        in_specs=in_specs,
        out_specs=pl.BlockSpec((tm, Hp), lambda i, k: (i, 0)),
        out_shape=jax.ShapeDtypeStruct((Np, Hp), A.dtype),
        scratch_shapes=[pltpu.VMEM((tm, acc_w), jnp.float32)],
        compiler_params=_compiler_params(blk, grid_rank=2),
    )(*args)


def _gin_layer2_classifier(A, x1, w1, b1, w2, b2, wl1, wl2, bl, nclass, *, tm, tk):
    """Second GIN layer fused with concat-classifier + log_softmax -> [Np, Cp] f32."""
    Np = A.shape[0]
    Hp = w1.shape[1]
    Cp = wl1.shape[1]
    isz = A.dtype.itemsize
    blk = (tm * tk + tk * Hp + tm * Hp + 2 * Hp * Hp + 2 * Hp * Cp) * isz \
        + (2 * Hp + Cp) * 4 + tm * Cp * 4 + tm * Hp * 4

    return pl.pallas_call(
        functools.partial(_gin_layer2_cls_kernel, nclass=nclass),
        grid=(Np // tm, Np // tk),
        in_specs=[
            pl.BlockSpec((tm, tk), lambda i, k: (i, k)),        # adjacency block (streamed)
            pl.BlockSpec((tk, Hp), lambda i, k: (k, 0)),        # x1 source-node block
            pl.BlockSpec((tm, Hp), lambda i, k: (i, 0)),        # x1 row block (self + classifier)
            pl.BlockSpec((Hp, Hp), lambda i, k: (0, 0)),        # W1
            pl.BlockSpec((1, Hp), lambda i, k: (0, 0)),         # b1
            pl.BlockSpec((Hp, Hp), lambda i, k: (0, 0)),        # W2
            pl.BlockSpec((1, Hp), lambda i, k: (0, 0)),         # b2
            pl.BlockSpec((Hp, Cp), lambda i, k: (0, 0)),        # Wlin (x1 half)
            pl.BlockSpec((Hp, Cp), lambda i, k: (0, 0)),        # Wlin (x2 half)
            pl.BlockSpec((1, Cp), lambda i, k: (0, 0)),         # blin
        ],
        out_specs=pl.BlockSpec((tm, Cp), lambda i, k: (i, 0)),  # lane-dense (Cp = 128) stores
        out_shape=jax.ShapeDtypeStruct((Np, Cp), jnp.float32),
        scratch_shapes=[pltpu.VMEM((tm, Hp), jnp.float32)],
        compiler_params=_compiler_params(blk, grid_rank=2),
    )(A, x1, x1, w1, b1, w2, b2, wl1, wl2, bl)


# ----------------------------------------------------------------------------- model
def gin_forward(x, adj, params, *, tm=DEF_TM, tk=DEF_TK, store_dtype=STORE_DTYPE):
    """x: [N, nfeat] f32, adj: [N, N] f32 dense adjacency (adj[dst, src] = w)."""
    N, F = x.shape
    H = params["w1a"].shape[1]
    nclass = params["bl"].shape[-1]

    tile = math.lcm(tm, tk)
    Np = _round_up(N, tile)         # node rows padded so both tm and tk divide Np
    Fp = _round_up(F, LANE)         # lane-pad feature / hidden / class dims
    Hp = _round_up(H, LANE)
    Cp = _round_up(nclass, LANE)

    xp = _pad2(x, Np, Fp).astype(store_dtype)
    Ap = _pad2(adj, Np, Np).astype(store_dtype)     # no self-loops added: (1+eps)*x handles self

    w1a = _pad2(params["w1a"], Fp, Hp).astype(store_dtype)
    w2a = _pad2(params["w2a"], Hp, Hp).astype(store_dtype)
    w1b = _pad2(params["w1b"], Hp, Hp).astype(store_dtype)
    w2b = _pad2(params["w2b"], Hp, Hp).astype(store_dtype)
    b1a = _pad2(params["b1a"], 1, Hp).astype(jnp.float32)
    b2a = _pad2(params["b2a"], 1, Hp).astype(jnp.float32)
    b1b = _pad2(params["b1b"], 1, Hp).astype(jnp.float32)
    b2b = _pad2(params["b2b"], 1, Hp).astype(jnp.float32)

    # classifier weight, split per concat-half so it matches [x1_pad | x2_pad]
    wl = params["wl"]
    wl1 = _pad2(wl[:H], Hp, Cp).astype(store_dtype)             # [Hp, Cp]
    wl2 = _pad2(wl[H:], Hp, Cp).astype(store_dtype)             # [Hp, Cp]
    bl_p = _pad2(params["bl"], 1, Cp).astype(jnp.float32)

    x1 = _gin_layer1(Ap, xp, w1a, b1a, w2a, b2a, tm=tm, tk=tk)                  # [Np, Hp]
    out_p = _gin_layer2_classifier(Ap, x1, w1b, b1b, w2b, b2b,
                                   wl1, wl2, bl_p, nclass, tm=tm, tk=tk)        # [Np, Cp] f32
    return out_p[:N, :nclass]


def gin_reference(x, adj, params):
    """Pure-JAX f32 reference matching the PyTorch module (eval mode)."""
    def conv(xin, w1, b1, w2, b2):
        h = xin + adj @ xin
        h = jnp.maximum(h @ w1 + b1, 0.0) @ w2 + b2
        return jnp.maximum(h, 0.0)
    x1 = conv(x, params["w1a"], params["b1a"], params["w2a"], params["b2a"])
    x2 = conv(x1, params["w1b"], params["b1b"], params["w2b"], params["b2b"])
    logits = jnp.concatenate([x1, x2], axis=-1) @ params["wl"] + params["bl"]
    return jax.nn.log_softmax(logits, axis=1)


def build_dense_adj(edge_index, num_nodes, edge_weight=None):
    """edge_index: [2, E] int32 (row 0 = src, row 1 = dst); aggregation gathers x_src into dst."""
    src, dst = edge_index[0], edge_index[1]
    if edge_weight is None:
        edge_weight = jnp.ones(src.shape, jnp.float32)
    A = jnp.zeros((num_nodes, num_nodes), jnp.float32)
    return A.at[dst, src].add(edge_weight)


def init_params(key, nfeat, nhid, nclass, nlayer=2):
    ks = jax.random.split(key, 5)

    def lin(k, fan_in, fan_out):
        kw, kb = jax.random.split(k)
        w = jax.random.normal(kw, (fan_in, fan_out), jnp.float32) * (1.0 / jnp.sqrt(fan_in))
        b = jax.random.normal(kb, (1, fan_out), jnp.float32) * 0.01
        return w, b

    w1a, b1a = lin(ks[0], nfeat, nhid)
    w2a, b2a = lin(ks[1], nhid, nhid)
    w1b, b1b = lin(ks[2], nhid, nhid)
    w2b, b2b = lin(ks[3], nhid, nhid)
    wl, bl = lin(ks[4], nhid * nlayer, nclass)       # final Linear over concat(nhid*nlayer)
    return dict(w1a=w1a, b1a=b1a, w2a=w2a, b2a=b2a,
                w1b=w1b, b1b=b1b, w2b=w2b, b2b=b2b,
                wl=wl, bl=bl)


# ----------------------------------------------------------------------------- test
if __name__ == "__main__":
    def run_case(nfeat, nhid, nclass, N, key):
        kx, kp = jax.random.split(key)
        x = jax.random.normal(kx, (N, nfeat), jnp.float32)

        # deterministic bidirectional ring graph: src -> dst
        src = jnp.arange(N, dtype=jnp.int32)
        dst = (src + 1) % N
        edge_index = jnp.stack([jnp.concatenate([src, dst]),
                                jnp.concatenate([dst, src])], axis=0)   # [2, 2N]
        adj = build_dense_adj(edge_index, N)

        params = init_params(kp, nfeat, nhid, nclass)
        out = gin_forward(x, adj, params)
        jax.block_until_ready(out)

        ref = gin_reference(x, adj, params)
        assert out.shape == (N, nclass)
        assert bool(jnp.allclose(jnp.sum(jnp.exp(out), axis=1), 1.0, atol=1e-3))
        # bf16 storage / f32 accumulate: compare probabilities with a loose tolerance
        assert float(jnp.max(jnp.abs(jnp.exp(out) - jnp.exp(ref)))) < 0.05
        return out

    key = jax.random.PRNGKey(0)
    k1, k2, k3 = jax.random.split(key, 3)
    run_case(nfeat=8,   nhid=32, nclass=4, N=16,  key=k1)   # non-reassoc path (Fp <= Hp)
    run_case(nfeat=256, nhid=32, nclass=4, N=16,  key=k2)   # re-associated layer-1 path
    run_case(nfeat=64,  nhid=48, nclass=5, N=300, key=k3)   # multi row-tile + multi K-tile grid
    print("KERNEL_OK")
</pallas_src>

<mosaic_0001>
module attributes {stable_mosaic.version = 11 : i64} {
  func.func @_gin_layer_kernel(%arg0: i32, %arg1: i32, %arg2: memref<128x256xbf16, #tpu.memory_space<vmem>>, %arg3: memref<256x128xbf16, #tpu.memory_space<vmem>>, %arg4: memref<128x128xbf16, #tpu.memory_space<vmem>>, %arg5: memref<128x128xbf16, #tpu.memory_space<vmem>>, %arg6: memref<1x128xf32, #tpu.memory_space<vmem>>, %arg7: memref<128x128xbf16, #tpu.memory_space<vmem>>, %arg8: memref<1x128xf32, #tpu.memory_space<vmem>>, %arg9: memref<128x128xbf16, #tpu.memory_space<vmem>>, %arg10: memref<128x128xf32, #tpu.memory_space<vmem>>) attributes {dimension_semantics = [#tpu.dimension_semantics<parallel>, #tpu.dimension_semantics<arbitrary>], iteration_bounds = array<i64: 2, 1>, scalar_prefetch = 0 : i64, scratch_operands = 1 : i64, tpu.core_type = #tpu.core_type<tc>, window_params = [{transform_indices = @transform_0, window_bounds = array<i64: 128, 256>}, {transform_indices = @transform_1, window_bounds = array<i64: 256, 128>}, {transform_indices = @transform_2, window_bounds = array<i64: 128, 128>}, {pipeline_mode = #tpu.pipeline_mode<synchronous>, transform_indices = @transform_3, window_bounds = array<i64: 128, 128>}, {pipeline_mode = #tpu.pipeline_mode<synchronous>, transform_indices = @transform_4, window_bounds = array<i64: 1, 128>}, {pipeline_mode = #tpu.pipeline_mode<synchronous>, transform_indices = @transform_5, window_bounds = array<i64: 128, 128>}, {pipeline_mode = #tpu.pipeline_mode<synchronous>, transform_indices = @transform_6, window_bounds = array<i64: 1, 128>}, {transform_indices = @transform_7, window_bounds = array<i64: 128, 128>}]} {
    %c0_i32 = arith.constant 0 : i32
    %0 = arith.cmpi eq, %arg1, %c0_i32 : i32
    %1 = arith.extui %0 : i1 to i32
    %c0_i32_0 = arith.constant 0 : i32
    %2 = arith.cmpi ne, %1, %c0_i32_0 : i32
    scf.if %2 {
      %c0_10 = arith.constant 0 : index
      %c0_11 = arith.constant 0 : index
      %12 = vector.load %arg4[%c0_10, %c0_11] : memref<128x128xbf16, #tpu.memory_space<vmem>>, vector<128x128xbf16>
      %13 = arith.extf %12 : vector<128x128xbf16> to vector<128x128xf32>
      %c0_12 = arith.constant 0 : index
      %c0_13 = arith.constant 0 : index
      %14 = vector.load %arg10[%c0_12, %c0_13] : memref<128x128xf32, #tpu.memory_space<vmem>>, vector<128x128xf32>
      tpu.vector_store %arg10[%c0_12, %c0_13], %13 {strides = array<i32>} : memref<128x128xf32, #tpu.memory_space<vmem>>, vector<128x128xf32>,
    } else {
    }
    %c0 = arith.constant 0 : index
    %c0_1 = arith.constant 0 : index
    %3 = vector.load %arg10[%c0, %c0_1] : memref<128x128xf32, #tpu.memory_space<vmem>>, vector<128x128xf32>
    %c0_2 = arith.constant 0 : index
    %c0_3 = arith.constant 0 : index
    %4 = vector.load %arg2[%c0_2, %c0_3] : memref<128x256xbf16, #tpu.memory_space<vmem>>, vector<128x256xbf16>
    %c0_4 = arith.constant 0 : index
    %c0_5 = arith.constant 0 : index
    %5 = vector.load %arg3[%c0_4, %c0_5] : memref<256x128xbf16, #tpu.memory_space<vmem>>, vector<256x128xbf16>
    %cst = arith.constant dense<0.000000e+00> : vector<128x128xf32>
    %6 = tpu.matmul %4, %5, %cst {dimension_numbers = #tpu.dot_dimension_numbers<[1], [0], [0], [1], [0, 0, 1, 1], [], []>} : vector<128x256xbf16>, vector<256x128xbf16>, vector<128x128xf32> -> vector<128x128xf32>
    %7 = arith.addf %3, %6 : vector<128x128xf32>
    %c0_6 = arith.constant 0 : index
    %c0_7 = arith.constant 0 : index
    %8 = vector.load %arg10[%c0_6, %c0_7] : memref<128x128xf32, #tpu.memory_space<vmem>>, vector<128x128xf32>
    tpu.vector_store %arg10[%c0_6, %c0_7], %7 {strides = array<i32>} : memref<128x128xf32, #tpu.memory_space<vmem>>, vector<128x128xf32>,
    %c0_i32_8 = arith.constant 0 : i32
    %9 = arith.cmpi eq, %arg1, %c0_i32_8 : i32
    %10 = arith.extui %9 : i1 to i32
    %c0_i32_9 = arith.constant 0 : i32
    %11 = arith.cmpi ne, %10, %c0_i32_9 : i32
    scf.if %11 {
      %c0_10 = arith.constant 0 : index
      %c0_11 = arith.constant 0 : index
      %12 = vector.load %arg10[%c0_10, %c0_11] : memref<128x128xf32, #tpu.memory_space<vmem>>, vector<128x128xf32>
      %13 = arith.truncf %12 : vector<128x128xf32> to vector<128x128xbf16>
      %c0_12 = arith.constant 0 : index
      %c0_13 = arith.constant 0 : index
      %14 = vector.load %arg5[%c0_12, %c0_13] : memref<128x128xbf16, #tpu.memory_space<vmem>>, vector<128x128xbf16>
      %cst_14 = arith.constant dense<0.000000e+00> : vector<128x128xf32>
      %15 = tpu.matmul %13, %14, %cst_14 {dimension_numbers = #tpu.dot_dimension_numbers<[1], [0], [0], [1], [0, 0, 1, 1], [], []>} : vector<128x128xbf16>, vector<128x128xbf16>, vector<128x128xf32> -> vector<128x128xf32>
      %c0_15 = arith.constant 0 : index
      %c0_16 = arith.constant 0 : index
      %16 = vector.load %arg6[%c0_15, %c0_16] : memref<1x128xf32, #tpu.memory_space<vmem>>, vector<1x128xf32>
      %17 = vector.broadcast %16 : vector<1x128xf32> to vector<128x128xf32>
      %18 = arith.addf %15, %17 : vector<128x128xf32>
      %cst_17 = arith.constant 0.000000e+00 : f32
      %19 = vector.broadcast %cst_17 : f32 to vector<128x128xf32>
      %20 = arith.maximumf %18, %19 : vector<128x128xf32>
      %21 = arith.truncf %20 : vector<128x128xf32> to vector<128x128xbf16>
      %c0_18 = arith.constant 0 : index
      %c0_19 = arith.constant 0 : index
      %22 = vector.load %arg7[%c0_18, %c0_19] : memref<128x128xbf16, #tpu.memory_space<vmem>>, vector<128x128xbf16>
      %cst_20 = arith.constant dense<0.000000e+00> : vector<128x128xf32>
      %23 = tpu.matmul %21, %22, %cst_20 {dimension_numbers = #tpu.dot_dimension_numbers<[1], [0], [0], [1], [0, 0, 1, 1], [], []>} : vector<128x128xbf16>, vector<128x128xbf16>, vector<128x128xf32> -> vector<128x128xf32>
      %c0_21 = arith.constant 0 : index
      %c0_22 = arith.constant 0 : index
      %24 = vector.load %arg8[%c0_21, %c0_22] : memref<1x128xf32, #tpu.memory_space<vmem>>, vector<1x128xf32>
      %25 = vector.broadcast %24 : vector<1x128xf32> to vector<128x128xf32>
      %26 = arith.addf %23, %25 : vector<128x128xf32>
      %cst_23 = arith.constant 0.000000e+00 : f32
      %27 = vector.broadcast %cst_23 : f32 to vector<128x128xf32>
      %28 = arith.maximumf %26, %27 : vector<128x128xf32>
      %29 = arith.truncf %28 : vector<128x128xf32> to vector<128x128xbf16>
      %c0_24 = arith.constant 0 : index
      %c0_25 = arith.constant 0 : index
      %30 = vector.load %arg9[%c0_24, %c0_25] : memref<128x128xbf16, #tpu.memory_space<vmem>>, vector<128x128xbf16>
      tpu.vector_store %arg9[%c0_24, %c0_25], %29 {strides = array<i32>} : memref<128x128xbf16, #tpu.memory_space<vmem>>, vector<128x128xbf16>,
    } else {
    }
    return
  }
  func.func @transform_0(%arg0: i32, %arg1: i32) -> (i32, i32) {
    %c0_i32 = arith.constant 0 : i32
    return %arg0, %arg1 : i32, i32
  }
  func.func @transform_1(%arg0: i32, %arg1: i32) -> (i32, i32) {
    %c0_i32 = arith.constant 0 : i32
    %c0_i32_0 = arith.constant 0 : i32
    return %arg1, %c0_i32 : i32, i32
  }
  func.func @transform_2(%arg0: i32, %arg1: i32) -> (i32, i32) {
    %c0_i32 = arith.constant 0 : i32
    %c0_i32_0 = arith.constant 0 : i32
    return %arg0, %c0_i32 : i32, i32
  }
  func.func @transform_3(%arg0: i32, %arg1: i32) -> (i32, i32) {
    %c0_i32 = arith.constant 0 : i32
    %c0_i32_0 = arith.constant 0 : i32
    %c0_i32_1 = arith.constant 0 : i32
    return %c0_i32, %c0_i32_0 : i32, i32
  }
  func.func @transform_4(%arg0: i32, %arg1: i32) -> (i32, i32) {
    %c0_i32 = arith.constant 0 : i32
    %c0_i32_0 = arith.constant 0 : i32
    %c0_i32_1 = arith.constant 0 : i32
    return %c0_i32, %c0_i32_0 : i32, i32
  }
  func.func @transform_5(%arg0: i32, %arg1: i32) -> (i32, i32) {
    %c0_i32 = arith.constant 0 : i32
    %c0_i32_0 = arith.constant 0 : i32
    %c0_i32_1 = arith.constant 0 : i32
    return %c0_i32, %c0_i32_0 : i32, i32
  }
  func.func @transform_6(%arg0: i32, %arg1: i32) -> (i32, i32) {
    %c0_i32 = arith.constant 0 : i32
    %c0_i32_0 = arith.constant 0 : i32
    %c0_i32_1 = arith.constant 0 : i32
    return %c0_i32, %c0_i32_0 : i32, i32
  }
  func.func @transform_7(%arg0: i32, %arg1: i32) -> (i32, i32) {
    %c0_i32 = arith.constant 0 : i32
    %c0_i32_0 = arith.constant 0 : i32
    return %arg0, %c0_i32 : i32, i32
  }
}

</mosaic_0001>

<bundles_post_ra>
// kernel: tpu_custom_call.1
= control target key start
LH: loop header
LB: loop body
LE: loop exit
PB: predicated region body
PF: predicated region fallthrough
CT: control target
= control target key end

     0   :  { %s2369_s0 = inlined_call_operand.hbm [shape: bf16[256,256], index: 0, kind: input, shape index: {}]   ;;  %s2370_s1 = inlined_call_operand.hbm [shape: bf16[256,128], index: 1, kind: input, shape index: {}]   ;;  %s2371_s2 = inlined_call_operand.hbm [shape: bf16[256,128], index: 2, kind: input, shape index: {}]   ;;  %s2372_s3 = inlined_call_operand.hbm [shape: bf16[128,128], index: 3, kind: input, shape index: {}]   ;;  %s2373_s4 = inlined_call_operand.vmem [shape: f32[1,128], index: 4, kind: input, shape index: {}]   ;;  %s2374_s5 = inlined_call_operand.hbm [shape: bf16[128,128], index: 5, kind: input, shape index: {}]   ;;  %s2375_s6 = inlined_call_operand.vmem [shape: f32[1,128], index: 6, kind: input, shape index: {}]   ;;  %s2376_s7 = inlined_call_operand.hbm [shape: bf16[256,128], index: 7, kind: output, shape index: {}]  }
   0x1   :  { %2388 = sst [smem:[#allocation25_spill]] %s2369_s0 }
   0x2   :  { %2389 = sst [smem:[#allocation26_spill]] %s2370_s1 }
   0x3   :  { %2390 = sst [smem:[#allocation27_spill]] %s2376_s7 }
   0x4   :  { %12 = vsyncpa [#allocation4], 0 }
   0x5   :  { %14 = vsyncpa [#allocation4 + $0x1], 0 }
   0x6   :  { %15 = vsyncpa [#allocation7], 0 }
   0x7   :  { %16 = vsyncpa [#allocation11], 0 }
   0x8   :  { %17 = vsyncpa [#allocation5], 0 }
   0x9   :  { %19 = vsyncpa [#allocation5 + $0x1], 0  ;;  %s2085_s24 = smov 0   ;;  %s2087_s25 = smov 0  }
   0xa   :  { %s2089_s26 = smov 0   ;;  %s2091_s27 = smov 0  }
   0xb   :  { %s2093_s28 = smov 0   ;;  %s2095_s29 = smov 0  }
   0xc LB: > { %2391 = sst [smem:[#allocation19_spill]] %s2014_s24  ;;  %s2116_s30 = sadd.s32 4294967295, %s2034_s29   ;;  %s2034_s29 = sphi %s2095_s29, %s25_s29   ;;  %s2030_s28 = sphi %s2093_s28, %s2419_s28   ;;  %s2026_s27 = sphi %s2091_s27, %s2418_s27   ;;  %s2022_s26 = sphi %s2089_s26, %s2414_s26   ;;  %s2018_s25 = sphi %s2087_s25, %s2417_s25   ;;  %s2014_s24 = sphi %s2085_s24, %s2416_s24  }
   0xd   : > { %2392 = sst [smem:[#allocation20_spill]] %s2022_s26  ;;  %s1325_s8 = sadd.s32 4294967294, %s2034_s29  }
   0xe   : > { %2393 = sst [smem:[#allocation21_spill]] %s2034_s29  ;;  %p59_p0 = scmp.ne.s32.totalorder %s2018_s25, %s2014_s24 }
   0xf   : > { %p60_p1 = scmp.eq.s32.totalorder %s2116_s30, 0  ;;  %p219_p2 = scmp.eq.s32.totalorder %s2116_s30, 1 }
  0x10   : > { %p225_p3 = scmp.eq.s32.totalorder %s1325_s8, 1  ;;  %p1326_p5 = scmp.ge.s32.totalorder %s2034_s29, 1 }
  0x11   : > { %p2125_p4 = por %p60_p1, %p59_p0  ;;  %p232_p7 = scmp.lt.s32.totalorder %s2034_s29, 3 }
  0x12   : > { %p2130_p6 = por %p225_p3, %p59_p0  ;;  %s2397_s1 = sld [smem:[#allocation26_spill]] }
  0x13   : > { %p2138_p8 = pnand %p1326_p5, %p232_p7  ;;  %s2036_s15 = smov [#allocation6]  }
  0x14   : > { %s2395_s10 = scalar_select %p2130_p6, 1, 0 }
  0x15   : > { %p1698_p9 = pneg %p2138_p8  ;;  %s248_s16 = sshll.u32 %s2036_s15, 4  ;;  %s249_s16 = int_to_ptr.vmem [resolvable:$true] %s248_s16 }
  0x16   : > { %2396 = sst [smem:[#allocation22_spill]] %s2395_s10  ;;  %p1330_p11 = scmp.ge.s32.totalorder %s2034_s29, 2 }
  0x17   : > { %p2146_p10 = pnand %p1698_p9, %p60_p1  ;;  %s2377_s18 = smov 64  }
  0x18   : > { %s246_s13 = sshll.u32 %s2397_s1, 4  ;;  %s2379_s19 = smov 4   ;;  %s247_s13 = int_to_ptr.hbm [resolvable:$true] %s246_s13 }
  0x19   : > { %1701 = dma.hbm_to_vmem [thread:$0]  (!%p2146_p10), %s247_s13, 2048, %s249_s16, [#allocation7], %s2377_s18, %s2377_s18, %s2379_s19  }
  0x1a   : > { %s37_s20 = sadd.s32 1, %s2030_s28  ;;  %s46_s21 = sadd.s32 1, %s2022_s26 }
  0x1b   : > { %p39_p12 = scmp.ge.s32.totalorder %s37_s20, 2  ;;  %p53_p13 = scmp.ne.s32.totalorder %s2022_s26, %s2018_s25 }
  0x1c   : > { %p54_p0 = scmp.eq.s32.totalorder %s2034_s29, 0  ;;  %p1722_p7 = scmp.lt.s32.totalorder %s2034_s29, 2 }
  0x1d   : > { %s2421_s20 = smov (%p39_p12, %s37_s20), 0  ;;  %p2169_p5 = por %p219_p2, %p53_p13 }
  0x1e   : > { %2400 = sst [smem:[#allocation23_spill]] %s2421_s20  ;;  %p2163_p3 = por %p54_p0, %p53_p13 }
  0x1f   : > { %s41_s8 = ssub.s32 %s2030_s28, %s2421_s20  ;;  %s296_s11 = sand.u32 1, %s2034_s29  }
  0x20   : > { %p44_p9 = scmp.eq.s32.totalorder %s41_s8, 0  ;;  %s298_s12 = sand.u32 1, %s2022_s26  }
  0x21   : > { %s1331_s15 = sshll.u32 %s298_s12, 7  ;;  %s1543_s16 = sshll.u32 %s2030_s28, 7 }
  0x22   : > { %s2179_s13 = scalar_select %p44_p9, %s2022_s26, %s46_s21  }
  0x23   : > { %s2404_s0 = sld [smem:[#allocation25_spill]]  ;;  %s300_s24 = scalar_lea.vmem [#allocation3], %s1331_s15 }
  0x24   : > { %2403 = sst [smem:[#allocation24_spill]] %s2179_s13  ;;  %s311_s7 = sshll.u32 %s300_s24, 4  ;;  %s312_s7 = int_to_ptr.vmem [resolvable:$true] %s311_s7 }
  0x25   : > { %p2189_p2 = pnand %p1722_p7, %p2163_p3  ;;  %s1335_s21 = sshll.u32 %s298_s12, 6 }
  0x26   : > { %s297_s20 = scalar_lea.sflag [#allocation4], %s296_s11  ;;  %s2039_s13 = smov 128  }
  0x27   : > { %s2040_s26 = smov 8   ;;  %s260_s22 = sshll.u32 %s2372_s3, 4  ;;  %s261_s22 = int_to_ptr.hbm [resolvable:$true] %s260_s22 }
  0x28   : > { %s2041_s15 = smov [#allocation9]   ;;  %s277_s12 = sshll.u32 %s2374_s5, 4  ;;  %s278_s12 = int_to_ptr.hbm [resolvable:$true] %s277_s12 }
  0x29   : > { %s308_s1 = scalar_lea.hbm %s2404_s0, %s1543_s16  ;;  %s262_s16 = sshll.u32 %s2041_s15, 4  ;;  %s263_s16 = int_to_ptr.vmem [resolvable:$true] %s262_s16 }
  0x2a   : > { %s309_s10 = sshll.u32 %s308_s1, 4  ;;  %s325_s1 = scalar_lea.vmem [#allocation8], %s1335_s21  ;;  %s310_s10 = int_to_ptr.hbm [resolvable:$true] %s309_s10 }
  0x2b   : > { %1711 = dma.hbm_to_vmem [thread:$0]  (!%p2189_p2), %s310_s10, 2048, %s312_s7, %s297_s20, %s2039_s13, %s2039_s13, %s2040_s26  }
  0x2c   : > { %s333_s24 = sshll.u32 %s325_s1, 4  ;;  %s2406_s11 = smov 4   ;;  %s334_s24 = int_to_ptr.vmem [resolvable:$true] %s333_s24 }
  0x2d   : > { %s2407_s7 = smov 64   ;;  %s1544_s26 = sshll.u32 %s2030_s28, 6 }
  0x2e   : > { %1704 = dma.hbm_to_vmem [thread:$0]  (!%p2146_p10), %s261_s22, 1024, %s263_s16, [#allocation7], %s2407_s7, %s2407_s7, %s2406_s11  }
  0x2f   : > { %s2042_s10 = smov [#allocation10]   ;;  %s330_s18 = scalar_lea.hbm %s2371_s2, %s1544_s26 }
  0x30   : > { %s279_s13 = sshll.u32 %s2042_s10, 4  ;;  %s331_s19 = sshll.u32 %s330_s18, 4  ;;  %s280_s13 = int_to_ptr.vmem [resolvable:$true] %s279_s13  ;;  %s332_s19 = int_to_ptr.hbm [resolvable:$true] %s331_s19 }
  0x31   : > { %1707 = dma.hbm_to_vmem [thread:$0]  (!%p2146_p10), %s278_s12, 1024, %s280_s13, [#allocation11], %s2407_s7, %s2407_s7, %s2406_s11  }
  0x32   : > { %1714 = dma.hbm_to_vmem [thread:$0]  (!%p2189_p2), %s332_s19, 1024, %s334_s24, %s297_s20, %s2407_s7, %s2407_s7, %s2406_s11  }
  0x33   : > { %345 = sbr.rel (%p2138_p8) target bundleno = 647 (0x287), region = 48  ;;  %s347_s0 = sand.u32 (!%p2138_p8), 1, %s2116_s30  }
  0x34   : > { %s2224_s29 = sand.u32 (!%p2138_p8), 1, %s2018_s25   ;;  %s348_s22 = scalar_lea.sflag (!%p2138_p8), [#allocation4], %s347_s0 }
  0x35   : > { %s1339_s17 = sshll.u32 (!%p2138_p8), %s2224_s29, 7 }
  0x36   : > { %s2227_s15 = scalar_lea.vmem (!%p2138_p8), [#allocation3], %s1339_s17 }
  0x38   : > { %1989 = dma.done.wait (%p2125_p4), %s348_s22, 2048  }
  0x39   : > { %1991 = vsyncadd (%p2125_p4), %s348_s22, 4294965248 }
  0x3a   : > { %1993 = dma.done.wait (%p60_p1), [#allocation7], 2048  }
  0x3b   : > { %1995 = vsyncadd (%p60_p1), [#allocation7], 4294965248  ;;  %s1341_s14 = sshll.u32 %s2224_s29, 6 }
  0x3c   : > { %s2240_s20 = scalar_lea.vmem [#allocation8], %s1341_s14 }
  0x3d   : > { %1997 = dma.done.wait (%p2125_p4), %s348_s22, 1024  }
  0x3e   : > { %1999 = vsyncadd (%p2125_p4), %s348_s22, 4294966272 }
  0x3f   : > { %2001 = dma.done.wait (%p60_p1), [#allocation7], 1024  }
  0x40   : > { %2003 = vsyncadd (%p60_p1), [#allocation7], 4294966272 }
  0x41   : > { %2005 = dma.done.wait (%p60_p1), [#allocation11], 1024  }
  0x42   : > { %2007 = vsyncadd (%p60_p1), [#allocation11], 4294966272  ;;  %v1568_v0 = vld [vmem:[#allocation6 + $0x38] sm:$0xff]  ;;  %v1567_v2 = vld [vmem:[#allocation6 + $0x30] sm:$0xff]  ;;  %s2306_s16 = scalar_lea.vmem [#allocation12], %s1341_s14  ;;  %s1593_s12 = sshll.u32 %s2026_s27, 6 }
  0x43   : > { %v1576_v1 = vld [vmem:[#allocation6 + $0x78] sm:$0xff]  ;;  %710 = vmatpush.bf16.msra.mxu0 %v1568_v0  ;;  %v1575_v3 = vld [vmem:[#allocation6 + $0x70] sm:$0xff]  ;;  %v1566_v4 = vld [vmem:[#allocation6 + $0x28] sm:$0xff]  ;;  %s2408_s26 = sld [smem:[#allocation27_spill]]  ;;  %s1186_s21 = sshll.u32 %s2306_s16, 4  ;;  %s1187_s21 = int_to_ptr.vmem [resolvable:$true] %s1186_s21 }
  0x44   : > { %759 = vmatpush.bf16.msra.mxu1 %v1576_v1  ;;  %v1574_v5 = vld [vmem:[#allocation6 + $0x68] sm:$0xff]  ;;  %v1565_v6 = vld [vmem:[#allocation6 + $0x20] sm:$0xff]  ;;  %v1564_v8 = vld [vmem:[#allocation6 + $0x18] sm:$0xff]  ;;  %s1174_s18 = scalar_lea.sflag [#allocation5], %s2224_s29 }
  0x45   : > { %v1573_v7 = vld [vmem:[#allocation6 + $0x60] sm:$0xff]  ;;  %v1572_v9 = vld [vmem:[#allocation6 + $0x58] sm:$0xff]  ;;  %v1563_v10 = vld [vmem:[#allocation6 + $0x10] sm:$0xff] }
  0x46   : > { %v1571_v11 = vld [vmem:[#allocation6 + $0x50] sm:$0xff]  ;;  %v1562_v12 = vld [vmem:[#allocation6 + $0x8] sm:$0xff]  ;;  %v1561_v14 = vld [vmem:[#allocation6] sm:$0xff] }
  0x47   : > { %711 = vmatpush.bf16.msra.mxu0 %v1567_v2  ;;  %v1570_v13 = vld [vmem:[#allocation6 + $0x48] sm:$0xff]  ;;  %v1569_v15 = vld [vmem:[#allocation6 + $0x40] sm:$0xff]  ;;  %v1355_v22 = vld [vmem:[%s2227_s15 + $0x10] sm:$0xf] }
  0x48   : > { %760 = vmatpush.bf16.msra.mxu1 %v1575_v3  ;;  %v1347_v16 = vld [vmem:[%s2227_s15] sm:$0xf]  ;;  %v1546_v17 = vld [vmem:[%s2227_s15 + $0x4] sm:$0xf0]  ;;  %v1545_v18 = vld [vmem:[%s2227_s15 + $0x4] sm:$0xf] }
  0x49   : > { %v1349_v19 = vld [vmem:[%s2227_s15 + $0x8] sm:$0xf0]  ;;  %v1348_v20 = vor.u32 %v1546_v17, %v1347_v16  ;;  %v1548_v23 = vld [vmem:[%s2227_s15 + $0x14] sm:$0xf0]  ;;  %v1547_v24 = vld [vmem:[%s2227_s15 + $0x14] sm:$0xf]  ;;  %s2409_s10 = smov %s2408_s26  ;;  %s1185_s13 = scalar_lea.hbm %s2408_s26, %s1593_s12 }
  0x4a   : > { %v1352_v21 = vor.u32 %v1545_v18, %v1349_v19  ;;  %v1357_v25 = vld [vmem:[%s2227_s15 + $0x18] sm:$0xf0]  ;;  %v1356_v26 = vor.u32 %v1548_v23, %v1355_v22  ;;  %v1363_v28 = vld [vmem:[%s2227_s15 + $0x20] sm:$0xf]  ;;  %v1550_v29 = vld [vmem:[%s2227_s15 + $0x24] sm:$0xf0] }
  0x4b   : > { %712 = vmatpush.bf16.msra.mxu0 %v1566_v4  ;;  %v1360_v27 = vor.u32 %v1547_v24, %v1357_v25  ;;  %v1549_v30 = vld [vmem:[%s2227_s15 + $0x24] sm:$0xf]  ;;  %v1365_v31 = vld [vmem:[%s2227_s15 + $0x28] sm:$0xf0]  ;;  %v1364_v32 = vor.u32 %v1550_v29, %v1363_v28  ;;  %v1371_v34 = vld [vmem:[%s2227_s15 + $0x30] sm:$0xf] }
  0x4c   : > { %761 = vmatpush.bf16.msra.mxu1 %v1574_v5  ;;  %v1368_v33 = vor.u32 %v1549_v30, %v1365_v31  ;;  %v1552_v35 = vld [vmem:[%s2227_s15 + $0x34] sm:$0xf0]  ;;  %v1551_v36 = vld [vmem:[%s2227_s15 + $0x34] sm:$0xf]  ;;  %v1373_v37 = vld [vmem:[%s2227_s15 + $0x38] sm:$0xf0] }
  0x4d   : > { %v1372_v38 = vor.u32 %v1552_v35, %v1371_v34  ;;  %v1376_v39 = vor.u32 %v1551_v36, %v1373_v37  ;;  %v1379_v40 = vld [vmem:[%s2227_s15 + $0x40] sm:$0xf]  ;;  %v1554_v41 = vld [vmem:[%s2227_s15 + $0x44] sm:$0xf0]  ;;  %v1553_v42 = vld [vmem:[%s2227_s15 + $0x44] sm:$0xf] }
  0x4e   : > { %v1381_v43 = vld [vmem:[%s2227_s15 + $0x48] sm:$0xf0]  ;;  %v1380_v44 = vor.u32 %v1554_v41, %v1379_v40  ;;  %v1584_v46 = vld [vmem:[#allocation9 + $0x38] sm:$0xff]  ;;  %v1387_v47 = vld [vmem:[%s2227_s15 + $0x50] sm:$0xf]  ;;  %s1188_s1 = sshll.u32 %s1185_s13, 4  ;;  %s1189_s1 = int_to_ptr.hbm [resolvable:$true] %s1188_s1 }
  0x4f   : > { %713 = vmatpush.bf16.msra.mxu0 %v1565_v6  ;;  %v1384_v45 = vor.u32 %v1553_v42, %v1381_v43  ;;  %935 = vmatpush.bf16.msra.mxu2 %v1584_v46  ;;  %v1556_v48 = vld [vmem:[%s2227_s15 + $0x54] sm:$0xf0]  ;;  %v1555_v49 = vld [vmem:[%s2227_s15 + $0x54] sm:$0xf]  ;;  %v1389_v50 = vld [vmem:[%s2227_s15 + $0x58] sm:$0xf0] }
  0x50   : > { %762 = vmatpush.bf16.msra.mxu1 %v1573_v7  ;;  %v1388_v51 = vor.u32 %v1556_v48, %v1387_v47  ;;  %v1392_v52 = vor.u32 %v1555_v49, %v1389_v50  ;;  %v1583_v53 = vld [vmem:[#allocation9 + $0x30] sm:$0xff]  ;;  %v1582_v54 = vld [vmem:[#allocation9 + $0x28] sm:$0xff]  ;;  %v1581_v55 = vld [vmem:[#allocation9 + $0x20] sm:$0xff]  ;;  %s1950_s27 = sshra.s32 %s1189_s1, 4  ;;  %s1956_s22 = scalar_lea.hbm %s2409_s10, 128  ;;  %s1951_s27 = int_to_ptr.hbm [resolvable:$true] %s1950_s27 }
  0x51   : > { %v1395_v56 = vld [vmem:[%s2227_s15 + $0x60] sm:$0xf]  ;;  %v1558_v57 = vld [vmem:[%s2227_s15 + $0x64] sm:$0xf0]  ;;  %v1557_v58 = vld [vmem:[%s2227_s15 + $0x64] sm:$0xf]  ;;  %p1957_p10 = scmp.lt.s32.totalorder %s1951_s27, %s2409_s10 }
  0x52   : > { %v1397_v59 = vld [vmem:[%s2227_s15 + $0x68] sm:$0xf0]  ;;  %v1580_v60 = vld [vmem:[#allocation9 + $0x18] sm:$0xff]  ;;  %v1396_v61 = vor.u32 %v1558_v57, %v1395_v56  ;;  %v1579_v63 = vld [vmem:[#allocation9 + $0x10] sm:$0xff]  ;;  %s1952_s19 = scalar_lea.hbm %s1951_s27, 64 }
  0x53   : > { %714 = vmatpush.bf16.msra.mxu0 %v1564_v8  ;;  %936 = vmatpush.bf16.msra.mxu2 %v1583_v53  ;;  %v1400_v62 = vor.u32 %v1557_v58, %v1397_v59  ;;  %v1578_v0 = vld [vmem:[#allocation9 + $0x8] sm:$0xff]  ;;  %v1577_v1 = vld [vmem:[#allocation9] sm:$0xff]  ;;  %v1403_v2 = vld [vmem:[%s2227_s15 + $0x70] sm:$0xf]  ;;  %p1953_p1 = scmp.ne.s32.totalorder %s1951_s27, %s1952_s19  ;;  %p1958_p12 = scmp.lt.s32.totalorder %s1956_s22, %s1952_s19 }
  0x54   : > { %763 = vmatpush.bf16.msra.mxu1 %v1572_v9  ;;  %v1560_v3 = vld [vmem:[%s2227_s15 + $0x74] sm:$0xf0]  ;;  %v1559_v4 = vld [vmem:[%s2227_s15 + $0x74] sm:$0xf]  ;;  %v1405_v5 = vld [vmem:[%s2227_s15 + $0x78] sm:$0xf0] }
  0x55   : > { %v1404_v6 = vor.u32 %v1560_v3, %v1403_v2  ;;  %v1408_v7 = vor.u32 %v1559_v4, %v1405_v5  ;;  %v1666_v22 = vld [vmem:[%s2240_s20 + $0x8] sm:$0xff]   ;;  %v1667_v34 = vld [vmem:[%s2240_s20 + $0x10] sm:$0xff]   ;;  %v1668_v46 = vld [vmem:[%s2240_s20 + $0x18] sm:$0xff]   ;;  %p1954_p4 = pnand %p1953_p1, %p2169_p5  ;;  %p1959_p13 = por %p1958_p12, %p1957_p10 }
  0x56   : > { %v1600_v23 = vunpack.c.l.bf16 %v1666_v22  ;;  %v1601_v25 = vunpack.c.h.bf16 %v1666_v22  ;;  %v1604_v35 = vunpack.c.l.bf16 %v1667_v34  ;;  %v1605_v37 = vunpack.c.h.bf16 %v1667_v34  ;;  %v1669_v58 = vld [vmem:[%s2240_s20 + $0x20] sm:$0xff]   ;;  %v1588_v34 = vld [vmem:[#allocation10 + $0x18] sm:$0xff] }
  0x57   : > { %715 = vmatpush.bf16.msra.mxu0 %v1563_v10  ;;  %937 = vmatpush.bf16.msra.mxu2 %v1582_v54  ;;  %v1595_v10 = vld [vmem:[%s2240_s20] sm:$0xff]   ;;  %v1608_v47 = vunpack.c.l.bf16 %v1668_v46  ;;  %v1609_v49 = vunpack.c.h.bf16 %v1668_v46  ;;  %v1612_v59 = vunpack.c.l.bf16 %v1669_v58  ;;  %p1955_p8 = pneg %p1954_p4 }
  0x58   : > { %764 = vmatpush.bf16.msra.mxu1 %v1571_v11  ;;  %v1596_v11 = vunpack.c.l.bf16 %v1595_v10  ;;  %v1585_v46 = vld [vmem:[#allocation10] sm:$0xff] }
  0x59   : > { %p1960_p0 = pnand %p1959_p13, %p1955_p8 }
  0x5b   : > { %716 = vmatpush.bf16.msra.mxu0 %v1562_v12  ;;  %938 = vmatpush.bf16.msra.mxu2 %v1581_v55 }
  0x5c   : > { %765 = vmatpush.bf16.msra.mxu1 %v1570_v13  ;;  %v1597_v13 = vunpack.c.h.bf16 %v1595_v10 }
  0x5f   : > { %717 = vmatpush.bf16.msra.mxu0 %v1561_v14  ;;  %939 = vmatpush.bf16.msra.mxu2 %v1580_v60 }
  0x60   : > { %766 = vmatpush.bf16.msra.mxu1 %v1569_v15 }
  0x62   : > { %718 = vmatmul.bf16.vlgmr.msra.gmra.mxu0 %v1348_v20 }
  0x63   : > { %767 = vmatmul.bf16.vlgmr.msra.gmra.mxu1 %v1352_v21  ;;  %940 = vmatpush.bf16.msra.mxu2 %v1579_v63 }
  0x67   : > { %941 = vmatpush.bf16.msra.mxu2 %v1578_v0 }
  0x6b   : > { %942 = vmatpush.bf16.msra.mxu2 %v1577_v1 }
  0x72   : > { %723 = vmatmul.bf16.gmra.mxu0 %v1356_v26 }
  0x73   : > { %772 = vmatmul.bf16.gmra.mxu1 %v1360_v27 }
  0x82   : > { %728 = vmatmul.bf16.gmra.mxu0 %v1364_v32 }
  0x83   : > { %777 = vmatmul.bf16.gmra.mxu1 %v1368_v33 }
  0x92   : > { %733 = vmatmul.bf16.gmra.mxu0 %v1372_v38 }
  0x93   : > { %782 = vmatmul.bf16.gmra.mxu1 %v1376_v39 }
  0xa2   : > { %738 = vmatmul.bf16.gmra.mxu0 %v1380_v44 }
  0xa3   : > { %787 = vmatmul.bf16.gmra.mxu1 %v1384_v45 }
  0xb2   : > { %743 = vmatmul.bf16.gmra.mxu0 %v1388_v51 }
  0xb3   : > { %792 = vmatmul.bf16.gmra.mxu1 %v1392_v52 }
  0xc2   : > { %748 = vmatmul.bf16.gmra.mxu0 %v1396_v61  ;;  %v1613_v61 = vunpack.c.h.bf16 %v1669_v58 }
  0xc3   : > { %797 = vmatmul.bf16.gmra.mxu1 %v1400_v62 }
  0xd2   : > { %753 = vmatmul.bf16.gmra.mxu0 %v1404_v6  ;;  %v1670_v6 = vld [vmem:[%s2240_s20 + $0x28] sm:$0xff]  }
  0xd3   : > { %802 = vmatmul.bf16.gmra.mxu1 %v1408_v7  ;;  %v1616_v7 = vunpack.c.l.bf16 %v1670_v6 }
  0xdf   : > { %v719_v8 = vpop.f32.mrf.mxu0 }
  0xe0   : > { %v768_v9 = vpop.f32.mrf.mxu1 }
  0xe1   : > { %v769_v12 = vadd.f32 %v768_v9, %v719_v8  ;;  %v1617_v9 = vunpack.c.h.bf16 %v1670_v6 }
  0xe3   : > { %v808_v17 = vadd.f32 %v1596_v11, %v769_v12 }
  0xe7   : > { %v721_v14 = vpop.f32.mrf.mxu0 }
  0xe8   : > { %v770_v15 = vpop.f32.mrf.mxu1 }
  0xe9   : > { %v771_v16 = vadd.f32 %v770_v15, %v721_v14 }
  0xeb   : > { %v809_v18 = vadd.f32 %v1597_v13, %v771_v16  ;;  %v1592_v16 = vld [vmem:[#allocation10 + $0x38] sm:$0xff] }
  0xec   : > { %1076 = vmatpush.bf16.msra.mxu3 %v1592_v16 }
  0xed   : > { %v859_v19 = vpack.c.bf16 %v809_v18, %v808_v17 }
  0xef   : > { %943 = vmatmul.bf16.vlgmr.msra.gmra.mxu2 %v859_v19  ;;  %v724_v20 = vpop.f32.mrf.mxu0  ;;  %v1591_v19 = vld [vmem:[#allocation10 + $0x30] sm:$0xff] }
  0xf0   : > { %v773_v21 = vpop.f32.mrf.mxu1  ;;  %1077 = vmatpush.bf16.msra.mxu3 %v1591_v19 }
  0xf1   : > { %v774_v24 = vadd.f32 %v773_v21, %v724_v20  ;;  %v1671_v20 = vld [vmem:[%s2240_s20 + $0x30] sm:$0xff]   ;;  %v1590_v21 = vld [vmem:[#allocation10 + $0x28] sm:$0xff] }
  0xf2   : > { %v1620_v22 = vunpack.c.l.bf16 %v1671_v20 }
  0xf3   : > { %v810_v29 = vadd.f32 %v1600_v23, %v774_v24  ;;  %v1621_v24 = vunpack.c.h.bf16 %v1671_v20 }
  0xf4   : > { %1078 = vmatpush.bf16.msra.mxu3 %v1590_v21 }
  0xf7   : > { %v726_v26 = vpop.f32.mrf.mxu0 }
  0xf8   : > { %v775_v27 = vpop.f32.mrf.mxu1 }
  0xf9   : > { %v776_v28 = vadd.f32 %v775_v27, %v726_v26 }
  0xfb   : > { %v811_v30 = vadd.f32 %v1601_v25, %v776_v28  ;;  %v1589_v28 = vld [vmem:[#allocation10 + $0x20] sm:$0xff] }
  0xfc   : > { %1079 = vmatpush.bf16.msra.mxu3 %v1589_v28 }
  0xfd   : > { %v860_v31 = vpack.c.bf16 %v811_v30, %v810_v29 }
  0xff   : > { %948 = vmatmul.bf16.gmra.mxu2 %v860_v31  ;;  %v729_v32 = vpop.f32.mrf.mxu0 }
 0x100   : > { %v778_v33 = vpop.f32.mrf.mxu1  ;;  %1080 = vmatpush.bf16.msra.mxu3 %v1588_v34 }
 0x101   : > { %v779_v36 = vadd.f32 %v778_v33, %v729_v32 }
 0x103   : > { %v812_v41 = vadd.f32 %v1604_v35, %v779_v36  ;;  %v1672_v35 = vld [vmem:[%s2240_s20 + $0x38] sm:$0xff]   ;;  %v1587_v36 = vld [vmem:[#allocation10 + $0x10] sm:$0xff] }
 0x104   : > { %1081 = vmatpush.bf16.msra.mxu3 %v1587_v36 }
 0x107   : > { %v731_v38 = vpop.f32.mrf.mxu0 }
 0x108   : > { %v780_v39 = vpop.f32.mrf.mxu1 }
 0x109   : > { %v781_v40 = vadd.f32 %v780_v39, %v731_v38  ;;  %v1625_v39 = vunpack.c.h.bf16 %v1672_v35 }
 0x10b   : > { %v813_v42 = vadd.f32 %v1605_v37, %v781_v40  ;;  %v1624_v37 = vunpack.c.l.bf16 %v1672_v35 }
 0x10d   : > { %v861_v43 = vpack.c.bf16 %v813_v42, %v812_v41  ;;  %v1586_v42 = vld [vmem:[#allocation10 + $0x8] sm:$0xff] }
 0x10e   : > { %1082 = vmatpush.bf16.msra.mxu3 %v1586_v42  ;;  %v2300_v42 = vld [vmem:[%s2375_s6] ss:$0 sm:$0xff] }
 0x10f   : > { %953 = vmatmul.bf16.gmra.mxu2 %v861_v43  ;;  %v734_v44 = vpop.f32.mrf.mxu0 }
 0x110   : > { %v783_v45 = vpop.f32.mrf.mxu1 }
 0x111   : > { %v784_v48 = vadd.f32 %v783_v45, %v734_v44 }
 0x112   : > { %1083 = vmatpush.bf16.msra.mxu3 %v1585_v46 }
 0x113   : > { %v814_v53 = vadd.f32 %v1608_v47, %v784_v48 }
 0x117   : > { %v736_v50 = vpop.f32.mrf.mxu0 }
 0x118   : > { %v785_v51 = vpop.f32.mrf.mxu1 }
 0x119   : > { %v786_v52 = vadd.f32 %v785_v51, %v736_v50 }
 0x11b   : > { %v815_v54 = vadd.f32 %v1609_v49, %v786_v52  ;;  %v1784_v49 = vld [vmem:[%s2373_s4] ss:$0 sm:$0xff] }
 0x11d   : > { %v862_v55 = vpack.c.bf16 %v815_v54, %v814_v53 }
 0x11f   : > { %958 = vmatmul.bf16.gmra.mxu2 %v862_v55  ;;  %v739_v56 = vpop.f32.mrf.mxu0 }
 0x120   : > { %v788_v57 = vpop.f32.mrf.mxu1 }
 0x121   : > { %v789_v60 = vadd.f32 %v788_v57, %v739_v56 }
 0x123   : > { %v816_v1 = vadd.f32 %v1612_v59, %v789_v60 }
 0x127   : > { %v741_v62 = vpop.f32.mrf.mxu0 }
 0x128   : > { %v790_v63 = vpop.f32.mrf.mxu1 }
 0x129   : > { %v791_v0 = vadd.f32 %v790_v63, %v741_v62 }
 0x12b   : > { %v817_v2 = vadd.f32 %v1613_v61, %v791_v0 }
 0x12d   : > { %v863_v3 = vpack.c.bf16 %v817_v2, %v816_v1 }
 0x12f   : > { %963 = vmatmul.bf16.gmra.mxu2 %v863_v3  ;;  %v744_v4 = vpop.f32.mrf.mxu0 }
 0x130   : > { %v793_v5 = vpop.f32.mrf.mxu1 }
 0x131   : > { %v794_v8 = vadd.f32 %v793_v5, %v744_v4 }
 0x133   : > { %v818_v13 = vadd.f32 %v1616_v7, %v794_v8 }
 0x137   : > { %v746_v10 = vpop.f32.mrf.mxu0 }
 0x138   : > { %v795_v11 = vpop.f32.mrf.mxu1 }
 0x139   : > { %v796_v12 = vadd.f32 %v795_v11, %v746_v10 }
 0x13b   : > { %v819_v14 = vadd.f32 %v1617_v9, %v796_v12 }
 0x13d   : > { %v864_v15 = vpack.c.bf16 %v819_v14, %v818_v13 }
 0x13f   : > { %968 = vmatmul.bf16.gmra.mxu2 %v864_v15  ;;  %v749_v17 = vpop.f32.mrf.mxu0 }
 0x140   : > { %v798_v18 = vpop.f32.mrf.mxu1 }
 0x141   : > { %v799_v23 = vadd.f32 %v798_v18, %v749_v17 }
 0x143   : > { %v820_v29 = vadd.f32 %v1620_v22, %v799_v23 }
 0x147   : > { %v751_v25 = vpop.f32.mrf.mxu0 }
 0x148   : > { %v800_v26 = vpop.f32.mrf.mxu1 }
 0x149   : > { %v801_v27 = vadd.f32 %v800_v26, %v751_v25 }
 0x14b   : > { %v821_v30 = vadd.f32 %v1621_v24, %v801_v27 }
 0x14d   : > { %v865_v31 = vpack.c.bf16 %v821_v30, %v820_v29 }
 0x14f   : > { %973 = vmatmul.bf16.gmra.mxu2 %v865_v31  ;;  %v754_v32 = vpop.f32.mrf.mxu0 }
 0x150   : > { %v803_v33 = vpop.f32.mrf.mxu1 }
 0x151   : > { %v804_v38 = vadd.f32 %v803_v33, %v754_v32 }
 0x153   : > { %v822_v44 = vadd.f32 %v1624_v37, %v804_v38 }
 0x157   : > { %v756_v40 = vpop.f32.mrf.mxu0 }
 0x158   : > { %v805_v41 = vpop.f32.mrf.mxu1 }
 0x159   : > { %v806_v43 = vadd.f32 %v805_v41, %v756_v40 }
 0x15b   : > { %v823_v45 = vadd.f32 %v1625_v39, %v806_v43 }
 0x15d   : > { %v866_v47 = vpack.c.bf16 %v823_v45, %v822_v44 }
 0x15f   : > { %978 = vmatmul.bf16.gmra.mxu2 %v866_v47 }
 0x172   : > { %v944_v48 = vpop.f32.mrf.mxu2 }
 0x173   : > { %v945_v50 = vadd.f32 %v1784_v49, %v944_v48 }
 0x175   : > { %v984_v53 = vmax.f32 %v945_v50, 0.0 }
 0x17a   : > { %v946_v51 = vpop.f32.mrf.mxu2 }
 0x17b   : > { %v947_v52 = vadd.f32 %v1784_v49, %v946_v51 }
 0x17d   : > { %v985_v54 = vmax.f32 %v947_v52, 0.0 }
 0x17f   : > { %v1000_v55 = vpack.c.bf16 %v985_v54, %v984_v53 }
 0x181   : > { %1084 = vmatmul.bf16.vlgmr.msra.gmra.mxu3 %v1000_v55 }
 0x182   : > { %v949_v56 = vpop.f32.mrf.mxu2 }
 0x183   : > { %v950_v57 = vadd.f32 %v1784_v49, %v949_v56 }
 0x185   : > { %v986_v60 = vmax.f32 %v950_v57, 0.0 }
 0x18a   : > { %v951_v58 = vpop.f32.mrf.mxu2 }
 0x18b   : > { %v952_v59 = vadd.f32 %v1784_v49, %v951_v58 }
 0x18d   : > { %v987_v61 = vmax.f32 %v952_v59, 0.0 }
 0x18f   : > { %v1001_v62 = vpack.c.bf16 %v987_v61, %v986_v60 }
 0x191   : > { %1089 = vmatmul.bf16.gmra.mxu3 %v1001_v62 }
 0x192   : > { %v954_v63 = vpop.f32.mrf.mxu2 }
 0x193   : > { %v955_v0 = vadd.f32 %v1784_v49, %v954_v63 }
 0x195   : > { %v988_v3 = vmax.f32 %v955_v0, 0.0 }
 0x19a   : > { %v956_v1 = vpop.f32.mrf.mxu2 }
 0x19b   : > { %v957_v2 = vadd.f32 %v1784_v49, %v956_v1 }
 0x19d   : > { %v989_v4 = vmax.f32 %v957_v2, 0.0 }
 0x19f   : > { %v1002_v5 = vpack.c.bf16 %v989_v4, %v988_v3 }
 0x1a1   : > { %1094 = vmatmul.bf16.gmra.mxu3 %v1002_v5 }
 0x1a2   : > { %v959_v6 = vpop.f32.mrf.mxu2 }
 0x1a3   : > { %v960_v7 = vadd.f32 %v1784_v49, %v959_v6 }
 0x1a5   : > { %v990_v10 = vmax.f32 %v960_v7, 0.0 }
 0x1aa   : > { %v961_v8 = vpop.f32.mrf.mxu2 }
 0x1ab   : > { %v962_v9 = vadd.f32 %v1784_v49, %v961_v8 }
 0x1ad   : > { %v991_v11 = vmax.f32 %v962_v9, 0.0 }
 0x1af   : > { %v1003_v12 = vpack.c.bf16 %v991_v11, %v990_v10 }
 0x1b1   : > { %1099 = vmatmul.bf16.gmra.mxu3 %v1003_v12 }
 0x1b2   : > { %v964_v13 = vpop.f32.mrf.mxu2 }
 0x1b3   : > { %v965_v14 = vadd.f32 %v1784_v49, %v964_v13 }
 0x1b5   : > { %v992_v17 = vmax.f32 %v965_v14, 0.0 }
 0x1ba   : > { %v966_v15 = vpop.f32.mrf.mxu2 }
 0x1bb   : > { %v967_v16 = vadd.f32 %v1784_v49, %v966_v15 }
 0x1bd   : > { %v993_v18 = vmax.f32 %v967_v16, 0.0 }
 0x1bf   : > { %v1004_v19 = vpack.c.bf16 %v993_v18, %v992_v17 }
 0x1c1   : > { %1104 = vmatmul.bf16.gmra.mxu3 %v1004_v19 }
 0x1c2   : > { %v969_v20 = vpop.f32.mrf.mxu2 }
 0x1c3   : > { %v970_v21 = vadd.f32 %v1784_v49, %v969_v20 }
 0x1c5   : > { %v994_v24 = vmax.f32 %v970_v21, 0.0 }
 0x1ca   : > { %v971_v22 = vpop.f32.mrf.mxu2 }
 0x1cb   : > { %v972_v23 = vadd.f32 %v1784_v49, %v971_v22 }
 0x1cd   : > { %v995_v25 = vmax.f32 %v972_v23, 0.0 }
 0x1cf   : > { %v1005_v26 = vpack.c.bf16 %v995_v25, %v994_v24 }
 0x1d1   : > { %1109 = vmatmul.bf16.gmra.mxu3 %v1005_v26 }
 0x1d2   : > { %v974_v27 = vpop.f32.mrf.mxu2 }
 0x1d3   : > { %v975_v28 = vadd.f32 %v1784_v49, %v974_v27 }
 0x1d5   : > { %v996_v31 = vmax.f32 %v975_v28, 0.0 }
 0x1da   : > { %v976_v29 = vpop.f32.mrf.mxu2 }
 0x1db   : > { %v977_v30 = vadd.f32 %v1784_v49, %v976_v29 }
 0x1dd   : > { %v997_v32 = vmax.f32 %v977_v30, 0.0 }
 0x1df   : > { %v1006_v33 = vpack.c.bf16 %v997_v32, %v996_v31 }
 0x1e1   : > { %1114 = vmatmul.bf16.gmra.mxu3 %v1006_v33 }
 0x1e2   : > { %v979_v34 = vpop.f32.mrf.mxu2 }
 0x1e3   : > { %v980_v35 = vadd.f32 %v1784_v49, %v979_v34 }
 0x1e5   : > { %v998_v38 = vmax.f32 %v980_v35, 0.0 }
 0x1ea   : > { %v981_v36 = vpop.f32.mrf.mxu2 }
 0x1eb   : > { %v982_v37 = vadd.f32 %v1784_v49, %v981_v36 }
 0x1ed   : > { %v999_v39 = vmax.f32 %v982_v37, 0.0 }
 0x1ef   : > { %v1007_v40 = vpack.c.bf16 %v999_v39, %v998_v38 }
 0x1f1   : > { %1119 = vmatmul.bf16.gmra.mxu3 %v1007_v40 }
 0x204   : > { %v1085_v41 = vpop.f32.mrf.mxu3 }
 0x205   : > { %v1086_v43 = vadd.f32 %v2300_v42, %v1085_v41 }
 0x207   : > { %v1125_v46 = vmax.f32 %v1086_v43, 0.0 }
 0x20c   : > { %v1087_v44 = vpop.f32.mrf.mxu3 }
 0x20d   : > { %v1088_v45 = vadd.f32 %v2300_v42, %v1087_v44 }
 0x20f   : > { %v1126_v47 = vmax.f32 %v1088_v45, 0.0 }
 0x211   : > { %v1629_v48 = vpack.c.bf16 %v1126_v47, %v1125_v46 }
 0x213   : > { %1630 = vst [vmem:[%s2306_s16] sm:$0xff] %v1629_v48  }
 0x214   : > { %v1090_v49 = vpop.f32.mrf.mxu3 }
 0x215   : > { %v1091_v50 = vadd.f32 %v2300_v42, %v1090_v49 }
 0x217   : > { %v1127_v53 = vmax.f32 %v1091_v50, 0.0 }
 0x21c   : > { %v1092_v51 = vpop.f32.mrf.mxu3 }
 0x21d   : > { %v1093_v52 = vadd.f32 %v2300_v42, %v1092_v51 }
 0x21f   : > { %v1128_v54 = vmax.f32 %v1093_v52, 0.0 }
 0x221   : > { %v1634_v55 = vpack.c.bf16 %v1128_v54, %v1127_v53 }
 0x223   : > { %1673 = vst [vmem:[%s2306_s16 + $0x8] sm:$0xff] %v1634_v55  }
 0x224   : > { %v1095_v56 = vpop.f32.mrf.mxu3 }
 0x225   : > { %v1096_v57 = vadd.f32 %v2300_v42, %v1095_v56 }
 0x227   : > { %v1129_v60 = vmax.f32 %v1096_v57, 0.0 }
 0x22c   : > { %v1097_v58 = vpop.f32.mrf.mxu3 }
 0x22d   : > { %v1098_v59 = vadd.f32 %v2300_v42, %v1097_v58 }
 0x22f   : > { %v1130_v61 = vmax.f32 %v1098_v59, 0.0 }
 0x231   : > { %v1639_v62 = vpack.c.bf16 %v1130_v61, %v1129_v60 }
 0x233   : > { %1674 = vst [vmem:[%s2306_s16 + $0x10] sm:$0xff] %v1639_v62  }
 0x234   : > { %v1100_v63 = vpop.f32.mrf.mxu3 }
 0x235   : > { %v1101_v0 = vadd.f32 %v2300_v42, %v1100_v63 }
 0x237   : > { %v1131_v3 = vmax.f32 %v1101_v0, 0.0 }
 0x23c   : > { %v1102_v1 = vpop.f32.mrf.mxu3 }
 0x23d   : > { %v1103_v2 = vadd.f32 %v2300_v42, %v1102_v1 }
 0x23f   : > { %v1132_v4 = vmax.f32 %v1103_v2, 0.0 }
 0x241   : > { %v1644_v5 = vpack.c.bf16 %v1132_v4, %v1131_v3 }
 0x243   : > { %1675 = vst [vmem:[%s2306_s16 + $0x18] sm:$0xff] %v1644_v5  }
 0x244   : > { %v1105_v6 = vpop.f32.mrf.mxu3 }
 0x245   : > { %v1106_v7 = vadd.f32 %v2300_v42, %v1105_v6 }
 0x247   : > { %v1133_v10 = vmax.f32 %v1106_v7, 0.0 }
 0x24c   : > { %v1107_v8 = vpop.f32.mrf.mxu3 }
 0x24d   : > { %v1108_v9 = vadd.f32 %v2300_v42, %v1107_v8 }
 0x24f   : > { %v1134_v11 = vmax.f32 %v1108_v9, 0.0 }
 0x251   : > { %v1649_v12 = vpack.c.bf16 %v1134_v11, %v1133_v10 }
 0x253   : > { %1676 = vst [vmem:[%s2306_s16 + $0x20] sm:$0xff] %v1649_v12  }
 0x254   : > { %v1110_v13 = vpop.f32.mrf.mxu3 }
 0x255   : > { %v1111_v14 = vadd.f32 %v2300_v42, %v1110_v13 }
 0x257   : > { %v1135_v17 = vmax.f32 %v1111_v14, 0.0 }
 0x25c   : > { %v1112_v15 = vpop.f32.mrf.mxu3 }
 0x25d   : > { %v1113_v16 = vadd.f32 %v2300_v42, %v1112_v15 }
 0x25f   : > { %v1136_v18 = vmax.f32 %v1113_v16, 0.0 }
 0x261   : > { %v1654_v19 = vpack.c.bf16 %v1136_v18, %v1135_v17 }
 0x263   : > { %1677 = vst [vmem:[%s2306_s16 + $0x28] sm:$0xff] %v1654_v19  }
 0x264   : > { %v1115_v20 = vpop.f32.mrf.mxu3 }
 0x265   : > { %v1116_v21 = vadd.f32 %v2300_v42, %v1115_v20 }
 0x267   : > { %v1137_v24 = vmax.f32 %v1116_v21, 0.0 }
 0x26c   : > { %v1117_v22 = vpop.f32.mrf.mxu3 }
 0x26d   : > { %v1118_v23 = vadd.f32 %v2300_v42, %v1117_v22 }
 0x26f   : > { %v1138_v25 = vmax.f32 %v1118_v23, 0.0 }
 0x271   : > { %v1659_v26 = vpack.c.bf16 %v1138_v25, %v1137_v24 }
 0x273   : > { %1678 = vst [vmem:[%s2306_s16 + $0x30] sm:$0xff] %v1659_v26  }
 0x274   : > { %v1120_v27 = vpop.f32.mrf.mxu3 }
 0x275   : > { %v1121_v28 = vadd.f32 %v2300_v42, %v1120_v27 }
 0x277   : > { %v1139_v31 = vmax.f32 %v1121_v28, 0.0 }
 0x27c   : > { %v1122_v29 = vpop.f32.mrf.mxu3 }
 0x27d   : > { %v1123_v30 = vadd.f32 %v2300_v42, %v1122_v29 }
 0x27f   : > { %v1140_v32 = vmax.f32 %v1123_v30, 0.0 }
 0x281   : > { %v1664_v33 = vpack.c.bf16 %v1140_v32, %v1139_v31 }
 0x283   : > { %1679 = vst [vmem:[%s2306_s16 + $0x38] sm:$0xff] %v1664_v33  }
 0x284   : > { %1963 = shalt.err (!%p1960_p0)
}
 0x285   : > { %s2043_s29 = smov 64   ;;  %s2044_s20 = smov 4  }
 0x286   : > { %1696 = dma.vmem_to_hbm [thread:$0]  (%p2169_p5), %s1187_s21, 1024, %s1189_s1, %s1174_s18, %s2043_s29, %s2043_s29, %s2044_s20  }
 0x287 PF: > { %s2410_s30 = sld [smem:[#allocation19_spill]]  ;;  %p1716_p3 = pnand %p1330_p11, %p2130_p6 }
 0x288   : > { %s2412_s8 = sld [smem:[#allocation21_spill]] }
 0x289   : > { %p1717_p7 = pneg %p1716_p3 }
 0x28d   : > { %s1203_s24 = sand.u32 1, %s2410_s30  }
 0x28e   : > { %s1204_s16 = scalar_lea.sflag [#allocation5], %s1203_s24 }
 0x28f   : > { %2009 = dma.done.wait (%p1717_p7), %s1204_s16, 1024  }
 0x290   : > { %2011 = vsyncadd (%p1717_p7), %s1204_s16, 4294966272  ;;  %s25_s29 = sadd.s32 1, %s2412_s8   ;;  %s2413_s12 = sld [smem:[#allocation20_spill]] }
 0x291   : > { %p22_p9 = scmp.ge.s32.totalorder %s25_s29, 4   ;;  %s2414_s26 = sld [smem:[#allocation24_spill]] }
 0x292   : > { %s2415_s23 = sld [smem:[#allocation23_spill]]  ;;  %s2416_s24 = smov %s2018_s25 }
 0x293   : > { %s2418_s27 = smov %s2030_s28 }
 0x294   :  { %24 = sbr.rel (!%p22_p9) target bundleno = 12 (0xc), region = 125 }
 0x296   : > { %s2417_s25 = smov %s2413_s12 }
 0x298   : > { %s2419_s28 = smov %s2415_s23 }
 0x299   :  { %1210 = vsyncpa [#allocation4], 1 }
 0x29a   :  { %1212 = vsyncpa [#allocation4 + $0x1], 1 }
 0x29b   :  { %1213 = vsyncpa [#allocation7], 1 }
 0x29c   :  { %1214 = vsyncpa [#allocation11], 1 }
 0x29d   :  { %1215 = vsyncpa [#allocation5], 1 }
 0x29e   :  { %1217 = vsyncpa [#allocation5 + $0x1], 1 }

</bundles_post_ra>
